<compile_context>
chip_gen: v7x
topology: tpu7x:2x2x1
jax: 0.10.0
libtpu: 0.0.40
codegen_flags: <defaults>
</compile_context>

<pallas_src>
import functools

import jax
import jax.numpy as jnp
from jax.experimental import pallas as pl
from jax.experimental.pallas import tpu as pltpu


BN_EPS = 1e-5
LEAKY_SLOPE = 0.1


def _round_up(x, m):
    return (x + m - 1) // m * m


# ---------------------------------------------------------------------------
# Phase 1: conv matmul (bf16 -> f32 acc) + per-tile partial BN sums.
# ---------------------------------------------------------------------------
def _conv_stats_kernel(p_ref, w_ref, y_ref, stats_ref):
    """p_ref: (bm, K) bf16, w_ref: (K, C_pad) bf16,
       y_ref: (bm, C_pad) f32, stats_ref: (8, C_pad) f32 (row0=sum, row1=sumsq)."""
    y = jnp.dot(p_ref[...], w_ref[...], preferred_element_type=jnp.float32)
    y_ref[...] = y
    s = jnp.sum(y, axis=0, keepdims=True)            # (1, C_pad)
    ss = jnp.sum(y * y, axis=0, keepdims=True)       # (1, C_pad)
    pad = jnp.zeros((6, y.shape[1]), dtype=jnp.float32)
    stats_ref[...] = jnp.concatenate([s, ss, pad], axis=0)


# ---------------------------------------------------------------------------
# Phase 2: folded BN affine (one mul + one add) + LeakyReLU(0.1).
# ---------------------------------------------------------------------------
def _bn_lrelu_kernel(y_ref, scale_ref, shift_ref, o_ref):
    """y_ref: (bm, C_pad) f32, scale/shift: (1, C_pad) f32, o_ref: (bm, C_pad) f32."""
    y_hat = y_ref[...] * scale_ref[...] + shift_ref[...]
    o_ref[...] = jnp.where(y_hat >= 0, y_hat, LEAKY_SLOPE * y_hat).astype(o_ref.dtype)


def _im2col(x, kernel_size, stride, padding):
    """x: (N, C, H, W) -> patches (N*H_out*W_out, C*k*k) in (C, kh, kw) feature order."""
    n, c, h, w = x.shape
    k = kernel_size
    h_out = (h + 2 * padding - k) // stride + 1
    w_out = (w + 2 * padding - k) // stride + 1
    x_pad = jnp.pad(x, ((0, 0), (0, 0), (padding, padding), (padding, padding)))
    slices = []
    for i in range(k):
        for j in range(k):
            sl = x_pad[:, :, i:i + (h_out - 1) * stride + 1:stride,
                       j:j + (w_out - 1) * stride + 1:stride]          # (N, C, H_out, W_out)
            slices.append(sl)
    patches = jnp.stack(slices, axis=0).reshape(k, k, n, c, h_out, w_out)
    patches = patches.transpose(2, 3, 0, 1, 4, 5)                      # (N, C, kh, kw, Ho, Wo)
    patches = patches.transpose(0, 4, 5, 1, 2, 3)                      # (N, Ho, Wo, C, kh, kw)
    patches = patches.reshape(n * h_out * w_out, c * k * k)
    return patches, h_out, w_out


@functools.partial(jax.jit,
                   static_argnames=("kernel_size", "stride", "padding", "block_m"))
def conv_bn_silu(x, weight, gamma, beta, *, kernel_size, stride, padding, block_m=512):
    """x: (N, C_in, H, W) NCHW; weight: (C_out, C_in, k, k); gamma/beta: (C_out,)."""
    n, c_in, _, _ = x.shape
    c_out = weight.shape[0]
    k = kernel_size

    patches, h_out, w_out = _im2col(x, k, stride, padding)             # (M, K) f32
    m, kk = patches.shape

    c_pad = _round_up(max(c_out, 128), 128)        # lane-dense output (multiple of 128)
    m_pad = _round_up(m, block_m)
    num_tiles = m_pad // block_m

    # bf16 matmul operands (MXU-native on v6e/v7x); accumulation stays f32 in-kernel.
    patches_b = jnp.pad(patches, ((0, m_pad - m), (0, 0))).astype(jnp.bfloat16)
    w_mat = weight.reshape(c_out, c_in * k * k).T                      # (K, C_out)
    w_mat = jnp.pad(w_mat, ((0, 0), (0, c_pad - c_out))).astype(jnp.bfloat16)

    # ---------------- Phase 1: conv + partial BN statistics ----------------
    y, stats = pl.pallas_call(
        _conv_stats_kernel,
        out_shape=(
            jax.ShapeDtypeStruct((m_pad, c_pad), jnp.float32),
            jax.ShapeDtypeStruct((num_tiles * 8, c_pad), jnp.float32),
        ),
        grid=(num_tiles,),
        in_specs=[
            pl.BlockSpec((block_m, kk), lambda i: (i, 0)),
            pl.BlockSpec((kk, c_pad), lambda i: (0, 0)),
        ],
        out_specs=(
            pl.BlockSpec((block_m, c_pad), lambda i: (i, 0)),
            pl.BlockSpec((8, c_pad), lambda i: (i, 0)),
        ),
        compiler_params=pltpu.CompilerParams(dimension_semantics=("parallel",)),
        cost_estimate=pl.CostEstimate(
            flops=2 * m_pad * kk * c_pad,
            transcendentals=0,
            bytes_accessed=(patches_b.size * 2 + w_mat.size * 2
                            + m_pad * c_pad * 4 + num_tiles * 8 * c_pad * 4),
        ),
    )(patches_b, w_mat)

    # Tiny cross-tile reduction + folding of BN into one scale/shift per channel.
    stats = stats.reshape(num_tiles, 8, c_pad)
    total_sum = jnp.sum(stats[:, 0, :], axis=0)                        # (C_pad,)
    total_sq = jnp.sum(stats[:, 1, :], axis=0)                         # (C_pad,)
    m_f = jnp.float32(m)                                               # true M (padding rows are 0)
    mean = total_sum / m_f
    var = jnp.maximum(total_sq / m_f - mean * mean, 0.0)
    inv_std = jax.lax.rsqrt(var + BN_EPS)
    gamma_p = jnp.pad(gamma.astype(jnp.float32), (0, c_pad - c_out), constant_values=1.0)
    beta_p = jnp.pad(beta.astype(jnp.float32), (0, c_pad - c_out))
    scale = (gamma_p * inv_std).reshape(1, c_pad)
    shift = (beta_p - mean * gamma_p * inv_std).reshape(1, c_pad)

    # ---------------- Phase 2: normalize + LeakyReLU(0.1) ----------------
    out_flat = pl.pallas_call(
        _bn_lrelu_kernel,
        out_shape=jax.ShapeDtypeStruct((m_pad, c_pad), jnp.float32),
        grid=(num_tiles,),
        in_specs=[
            pl.BlockSpec((block_m, c_pad), lambda i: (i, 0)),
            pl.BlockSpec((1, c_pad), lambda i: (0, 0)),
            pl.BlockSpec((1, c_pad), lambda i: (0, 0)),
        ],
        out_specs=pl.BlockSpec((block_m, c_pad), lambda i: (i, 0)),
        compiler_params=pltpu.CompilerParams(dimension_semantics=("parallel",)),
        cost_estimate=pl.CostEstimate(
            flops=3 * m_pad * c_pad,
            transcendentals=0,
            bytes_accessed=2 * m_pad * c_pad * 4,
        ),
    )(y, scale, shift)

    # Drop channel / row padding, back to NCHW.
    out = out_flat[:m, :c_out].reshape(n, h_out, w_out, c_out).transpose(0, 3, 1, 2)
    return out


def _reference(x, weight, gamma, beta, *, stride, padding):
    # Conv with bf16 operands + f32 accumulation (same numerics as the kernel's MXU path).
    y = jax.lax.conv_general_dilated(
        x.astype(jnp.bfloat16), weight.astype(jnp.bfloat16),
        window_strides=(stride, stride),
        padding=((padding, padding), (padding, padding)),
        dimension_numbers=("NCHW", "OIHW", "NCHW"),
        preferred_element_type=jnp.float32)
    mean = jnp.mean(y, axis=(0, 2, 3), keepdims=True)
    var = jnp.mean((y - mean) ** 2, axis=(0, 2, 3), keepdims=True)
    y_hat = (y - mean) * jax.lax.rsqrt(var + BN_EPS)
    y_hat = y_hat * gamma.reshape(1, -1, 1, 1) + beta.reshape(1, -1, 1, 1)
    # "silu" in the module is actually LeakyReLU(0.1).
    return jnp.where(y_hat >= 0, y_hat, LEAKY_SLOPE * y_hat)


if __name__ == "__main__":
    # ConvBNSiLU(in_channels=4, out_channels=8, kernel_size=3, stride=1, padding=1)
    N, C_IN, C_OUT, H, W = 2, 4, 8, 16, 16
    K, STRIDE, PAD = 3, 1, 1

    key = jax.random.PRNGKey(0)
    kx, kw = jax.random.split(key)
    x = jax.random.normal(kx, (N, C_IN, H, W), dtype=jnp.float32)
    weight = jax.random.normal(kw, (C_OUT, C_IN, K, K), dtype=jnp.float32) * 0.1
    gamma = jnp.ones((C_OUT,), dtype=jnp.float32)   # BatchNorm2d default affine init
    beta = jnp.zeros((C_OUT,), dtype=jnp.float32)

    # block_m=192 at this toy size (M = 512) exercises the multi-tile grid and the
    # M-padding path; production sizes use the default block_m=512.
    out = conv_bn_silu(x, weight, gamma, beta,
                       kernel_size=K, stride=STRIDE, padding=PAD, block_m=192)
    out = jax.block_until_ready(out)

    ref = _reference(x, weight, gamma, beta, stride=STRIDE, padding=PAD)
    assert out.shape == (N, C_OUT, H, W), out.shape
    assert jnp.allclose(out, ref, atol=2e-3, rtol=2e-3), float(jnp.max(jnp.abs(out - ref)))

    print("KERNEL_OK")
</pallas_src>

<mosaic_0001>
module attributes {stable_mosaic.version = 11 : i64} {
  func.func @_conv_stats_kernel(%arg0: i32, %arg1: memref<192x36xbf16, #tpu.memory_space<vmem>>, %arg2: memref<36x128xbf16, #tpu.memory_space<vmem>>, %arg3: memref<192x128xf32, #tpu.memory_space<vmem>>, %arg4: memref<8x128xf32, #tpu.memory_space<vmem>>) attributes {dimension_semantics = [#tpu.dimension_semantics<parallel>], iteration_bounds = array<i64: 3>, scalar_prefetch = 0 : i64, scratch_operands = 0 : i64, tpu.core_type = #tpu.core_type<tc>, window_params = [{transform_indices = @transform_0, window_bounds = array<i64: 192, 36>}, {pipeline_mode = #tpu.pipeline_mode<synchronous>, transform_indices = @transform_1, window_bounds = array<i64: 36, 128>}, {transform_indices = @transform_2, window_bounds = array<i64: 192, 128>}, {transform_indices = @transform_3, window_bounds = array<i64: 8, 128>}]} {
    %c0 = arith.constant 0 : index
    %c0_0 = arith.constant 0 : index
    %0 = vector.load %arg1[%c0, %c0_0] : memref<192x36xbf16, #tpu.memory_space<vmem>>, vector<192x36xbf16>
    %c0_1 = arith.constant 0 : index
    %c0_2 = arith.constant 0 : index
    %1 = vector.load %arg2[%c0_1, %c0_2] : memref<36x128xbf16, #tpu.memory_space<vmem>>, vector<36x128xbf16>
    %cst = arith.constant dense<0.000000e+00> : vector<192x128xf32>
    %2 = tpu.matmul %0, %1, %cst {dimension_numbers = #tpu.dot_dimension_numbers<[1], [0], [0], [1], [0, 0, 1, 1], [], []>} : vector<192x36xbf16>, vector<36x128xbf16>, vector<192x128xf32> -> vector<192x128xf32>
    %c0_3 = arith.constant 0 : index
    %c0_4 = arith.constant 0 : index
    %3 = vector.load %arg3[%c0_3, %c0_4] : memref<192x128xf32, #tpu.memory_space<vmem>>, vector<192x128xf32>
    tpu.vector_store %arg3[%c0_3, %c0_4], %2 {strides = array<i32>} : memref<192x128xf32, #tpu.memory_space<vmem>>, vector<192x128xf32>,
    %cst_5 = arith.constant dense<0.000000e+00> : vector<128xf32>
    %4 = vector.multi_reduction <add>, %2, %cst_5 [0] : vector<192x128xf32> to vector<128xf32>
    %5 = vector.shape_cast %4 : vector<128xf32> to vector<1x128xf32>
    %6 = arith.mulf %2, %2 : vector<192x128xf32>
    %cst_6 = arith.constant dense<0.000000e+00> : vector<128xf32>
    %7 = vector.multi_reduction <add>, %6, %cst_6 [0] : vector<192x128xf32> to vector<128xf32>
    %8 = vector.shape_cast %7 : vector<128xf32> to vector<1x128xf32>
    %cst_7 = arith.constant 0.000000e+00 : f32
    %9 = vector.broadcast %cst_7 : f32 to vector<6x128xf32>
    %10 = tpu.concatenate %5, %8, %9 in 0 : vector<1x128xf32>, vector<1x128xf32>, vector<6x128xf32> -> vector<8x128xf32>
    %c0_8 = arith.constant 0 : index
    %c0_9 = arith.constant 0 : index
    %11 = vector.load %arg4[%c0_8, %c0_9] : memref<8x128xf32, #tpu.memory_space<vmem>>, vector<8x128xf32>
    tpu.vector_store %arg4[%c0_8, %c0_9], %10 {strides = array<i32>} : memref<8x128xf32, #tpu.memory_space<vmem>>, vector<8x128xf32>,
    return
  }
  func.func @transform_0(%arg0: i32) -> (i32, i32) {
    %c0_i32 = arith.constant 0 : i32
    %c0_i32_0 = arith.constant 0 : i32
    return %arg0, %c0_i32 : i32, i32
  }
  func.func @transform_1(%arg0: i32) -> (i32, i32) {
    %c0_i32 = arith.constant 0 : i32
    %c0_i32_0 = arith.constant 0 : i32
    %c0_i32_1 = arith.constant 0 : i32
    return %c0_i32, %c0_i32_0 : i32, i32
  }
  func.func @transform_2(%arg0: i32) -> (i32, i32) {
    %c0_i32 = arith.constant 0 : i32
    %c0_i32_0 = arith.constant 0 : i32
    return %arg0, %c0_i32 : i32, i32
  }
  func.func @transform_3(%arg0: i32) -> (i32, i32) {
    %c0_i32 = arith.constant 0 : i32
    %c0_i32_0 = arith.constant 0 : i32
    return %arg0, %c0_i32 : i32, i32
  }
}

module attributes {stable_mosaic.version = 11 : i64} {
  func.func @_bn_lrelu_kernel(%arg0: i32, %arg1: memref<192x128xf32, #tpu.memory_space<vmem>>, %arg2: memref<1x128xf32, #tpu.memory_space<vmem>>, %arg3: memref<1x128xf32, #tpu.memory_space<vmem>>, %arg4: memref<192x128xf32, #tpu.memory_space<vmem>>) attributes {dimension_semantics = [#tpu.dimension_semantics<parallel>], iteration_bounds = array<i64: 3>, scalar_prefetch = 0 : i64, scratch_operands = 0 : i64, tpu.core_type = #tpu.core_type<tc>, window_params = [{transform_indices = @transform_0, window_bounds = array<i64: 192, 128>}, {pipeline_mode = #tpu.pipeline_mode<synchronous>, transform_indices = @transform_1, window_bounds = array<i64: 1, 128>}, {pipeline_mode = #tpu.pipeline_mode<synchronous>, transform_indices = @transform_2, window_bounds = array<i64: 1, 128>}, {transform_indices = @transform_3, window_bounds = array<i64: 192, 128>}]} {
    %c0 = arith.constant 0 : index
    %c0_0 = arith.constant 0 : index
    %0 = vector.load %arg1[%c0, %c0_0] : memref<192x128xf32, #tpu.memory_space<vmem>>, vector<192x128xf32>
    %c0_1 = arith.constant 0 : index
    %c0_2 = arith.constant 0 : index
    %1 = vector.load %arg2[%c0_1, %c0_2] : memref<1x128xf32, #tpu.memory_space<vmem>>, vector<1x128xf32>
    %2 = vector.broadcast %1 : vector<1x128xf32> to vector<192x128xf32>
    %3 = arith.mulf %0, %2 : vector<192x128xf32>
    %c0_3 = arith.constant 0 : index
    %c0_4 = arith.constant 0 : index
    %4 = vector.load %arg3[%c0_3, %c0_4] : memref<1x128xf32, #tpu.memory_space<vmem>>, vector<1x128xf32>
    %5 = vector.broadcast %4 : vector<1x128xf32> to vector<192x128xf32>
    %6 = arith.addf %3, %5 : vector<192x128xf32>
    %cst = arith.constant 0.000000e+00 : f32
    %7 = vector.broadcast %cst : f32 to vector<192x128xf32>
    %8 = arith.cmpf oge, %6, %7 : vector<192x128xf32>
    %cst_5 = arith.constant 1.000000e-01 : f32
    %9 = vector.broadcast %cst_5 : f32 to vector<192x128xf32>
    %10 = arith.mulf %9, %6 : vector<192x128xf32>
    %11 = arith.select %8, %6, %10 : vector<192x128xi1>, vector<192x128xf32>
    %c0_6 = arith.constant 0 : index
    %c0_7 = arith.constant 0 : index
    %12 = vector.load %arg4[%c0_6, %c0_7] : memref<192x128xf32, #tpu.memory_space<vmem>>, vector<192x128xf32>
    tpu.vector_store %arg4[%c0_6, %c0_7], %11 {strides = array<i32>} : memref<192x128xf32, #tpu.memory_space<vmem>>, vector<192x128xf32>,
    return
  }
  func.func @transform_0(%arg0: i32) -> (i32, i32) {
    %c0_i32 = arith.constant 0 : i32
    %c0_i32_0 = arith.constant 0 : i32
    return %arg0, %c0_i32 : i32, i32
  }
  func.func @transform_1(%arg0: i32) -> (i32, i32) {
    %c0_i32 = arith.constant 0 : i32
    %c0_i32_0 = arith.constant 0 : i32
    %c0_i32_1 = arith.constant 0 : i32
    return %c0_i32, %c0_i32_0 : i32, i32
  }
  func.func @transform_2(%arg0: i32) -> (i32, i32) {
    %c0_i32 = arith.constant 0 : i32
    %c0_i32_0 = arith.constant 0 : i32
    %c0_i32_1 = arith.constant 0 : i32
    return %c0_i32, %c0_i32_0 : i32, i32
  }
  func.func @transform_3(%arg0: i32) -> (i32, i32) {
    %c0_i32 = arith.constant 0 : i32
    %c0_i32_0 = arith.constant 0 : i32
    return %arg0, %c0_i32 : i32, i32
  }
}

</mosaic_0001>

<bundles_post_ra>
// kernel: conv_bn_silu.2
= control target key start
LH: loop header
LB: loop body
LE: loop exit
PB: predicated region body
PF: predicated region fallthrough
CT: control target
= control target key end

     0   :  { %s798_s12 = smov 0   ;;  %s902_s0 = inlined_call_operand.vmem [shape: bf16[576,36], index: 0, kind: input, shape index: {}]   ;;  %s903_s1 = inlined_call_operand.vmem [shape: bf16[36,128], index: 1, kind: input, shape index: {}]   ;;  %s904_s2 = inlined_call_operand.vmem [shape: f32[576,128], index: 2, kind: output, shape index: {0}]   ;;  %s905_s3 = inlined_call_operand.vmem [shape: f32[24,128], index: 3, kind: output, shape index: {1}]  }
   0x1 LB: > { %s804_s13 = sadd.s32 4294967295, %s776_s12   ;;  %p661_p0 = scmp.ge.s32.totalorder %s776_s12, 1  ;;  %s776_s12 = sphi %s798_s12, %s14_s12  }
   0x2   : > { %p141_p1 = scmp.lt.s32.totalorder %s776_s12, 4 }
   0x4   : > { %p142_p2 = pnand %p661_p0, %p141_p1 }
   0x5   : > { %v755_v0 = vld [vmem:[%s903_s1] sm:$0xff] (!%p142_p2)   ;;  %v756_v1 = vld [vmem:[%s903_s1 + $0x8] sm:$0xff] (!%p142_p2)   ;;  %s169_s18 = smul.u32 (!%p142_p2), 24, %s804_s13  ;;  %v757_v2 = vld [vmem:[%s903_s1 + $0x10] ss:$0 sps:$4 sm:$0x33] (!%p142_p2)  }
   0x6   : > { %145 = sbr.rel (%p142_p2) target bundleno = 296 (0x128), region = 28  ;;  %709 = vmatprep.subr.bf16.mxu0 (!%p142_p2), %v755_v0  ;;  %739 = vmatprep.subr.bf16.mxu1 (!%p142_p2), %v755_v0  ;;  %vm327_vm0 = vcmask (!%p142_p2), 1041408   ;;  %vm290_vm1 = vcmask (!%p142_p2), 293888   ;;  %p181_p4 = scmp.lt.s32.totalorder (!%p142_p2), %s804_s13, 2  ;;  %vm566_vm2 = vcmask (!%p142_p2), 1040384  }
   0x7   : > { %710 = vmatpush3.bf16.msra.mxu0 (!%p142_p2), %v755_v0  ;;  %p170_p3 = scmp.lt.s32.totalorder (!%p142_p2), %s169_s18, 71  ;;  %742 = vmatpush3.bf16.msra.mxu1 (!%p142_p2), %v755_v0  ;;  %v329_v3 = vsel (!%p142_p2), %vm327_vm0, %v757_v2, 0 }
   0x8   : > { %711 = vmatprep.subr.bf16.mxu0 (!%p142_p2), %v756_v1  ;;  %740 = vmatprep.subr.bf16.mxu1 (!%p142_p2), %v756_v1 }
   0xb   : > { %712 = vmatpush3.bf16.msra.mxu0 (!%p142_p2), %v756_v1  ;;  %743 = vmatpush3.bf16.msra.mxu1 (!%p142_p2), %v756_v1 }
   0xc   : > { %745 = vmatprep.subr.msk.bf16.mxu0 (!%p142_p2), %vm327_vm0, %v757_v2  ;;  %746 = vmatprep.subr.msk.bf16.mxu1 (!%p142_p2), %vm327_vm0, %v757_v2 }
   0xd   : > { %s907_s18 = smov (!%p170_p3, %s169_s18), 71  ;;  %s909_s13 = smov (!%p181_p4, %s804_s13), 2 }
   0xe   : > { %s662_s21 = sshll.u32 %s907_s18, 2  ;;  %s663_s25 = sshll.u32 %s907_s18, 3 }
   0xf   : > { %s173_s24 = scalar_lea.vmem %s902_s0, %s662_s21  ;;  %714 = vmatpush3.bf16.msra.mxu0 %v329_v3  ;;  %744 = vmatpush3.bf16.msra.mxu1 %v329_v3  ;;  %s843_s28 = scalar_lea.vmem %s904_s2, %s663_s25 }
  0x10   : > { %v758_v4 = vld [vmem:[%s173_s24] sm:$0xff]   ;;  %v759_v5 = vld [vmem:[%s173_s24 + $0x8] sm:$0xff]   ;;  %v760_v6 = vld [vmem:[%s173_s24 + $0x10] sm:$0xff]   ;;  %s664_s29 = sshll.u32 %s909_s13, 3 }
  0x11   : > { %715 = vmatprep.mubr.msk.bf16.mxu0 %vm290_vm1, %v758_v4  ;;  %v764_v7 = vld [vmem:[%s173_s24 + $0x30] sm:$0xff]   ;;  %v765_v8 = vld [vmem:[%s173_s24 + $0x38] sm:$0xff]   ;;  %v766_v9 = vld [vmem:[%s173_s24 + $0x40] sm:$0xff]   ;;  %s184_s5 = scalar_lea.vmem %s905_s3, %s664_s29 }
  0x12   : > { %716 = vmatmul.mubr.msk.bf16.vlgmr.msra.gmra.mrb[0].mxu0 %vm290_vm1, %v759_v5  ;;  %727 = vmatprep.mubr.msk.bf16.mxu1 %vm290_vm1, %v764_v7  ;;  %v761_v10 = vld [vmem:[%s173_s24 + $0x18] sm:$0xff]   ;;  %v762_v11 = vld [vmem:[%s173_s24 + $0x20] sm:$0xff]   ;;  %v767_v12 = vld [vmem:[%s173_s24 + $0x48] sm:$0xff]  }
  0x13   : > { %719 = vmatprep.mubr.msk.bf16.mxu0 %vm290_vm1, %v760_v6  ;;  %728 = vmatmul.mubr.msk.bf16.vlgmr.msra.gmra.mrb[0].mxu1 %vm290_vm1, %v765_v8  ;;  %v768_v13 = vld [vmem:[%s173_s24 + $0x50] sm:$0xff]   ;;  %v763_v14 = vld [vmem:[%s173_s24 + $0x28] sm:$0xff]   ;;  %v769_v15 = vld [vmem:[%s173_s24 + $0x58] sm:$0xff]  }
  0x14   : > { %731 = vmatprep.mubr.msk.bf16.mxu1 %vm290_vm1, %v766_v9 }
  0x1a   : > { %720 = vmatmul.mubr.msk.bf16.gmra.mrb[4].mxu0 %vm290_vm1, %v761_v10 }
  0x1b   : > { %723 = vmatprep.mubr.msk.bf16.mxu0 %vm290_vm1, %v762_v11  ;;  %732 = vmatmul.mubr.msk.bf16.gmra.mrb[4].mxu1 %vm290_vm1, %v767_v12 }
  0x1c   : > { %735 = vmatprep.mubr.msk.bf16.mxu1 %vm290_vm1, %v768_v13 }
  0x22   : > { %724 = vmatmul.mubr.msk.bf16.gmra.mrb[8].mxu0 %vm290_vm1, %v763_v14 }
  0x23   : > { %736 = vmatmul.mubr.msk.bf16.gmra.mrb[8].mxu1 %vm290_vm1, %v769_v15 }
  0xe5   : > { %v717_v16 = vpop.f32.mrb[0].mxu0 }
  0xe6   : > { %462 = vst [vmem:[%s843_s28 + $0x10] sm:$0xff] %v717_v16  ;;  %v365_v17 = vpop.f32.mrb[1].mxu0  ;;  %v849_v23 = vpop.f32.mrb[0].mxu1  ;;  %v515_v25 = vmul.f32 %v717_v16, %v717_v16 }
  0xe7   : > { %460 = vst [vmem:[%s843_s28] sm:$0xff] %v365_v17  ;;  %v718_v18 = vpop.f32.mrb[2].mxu0  ;;  %v513_v20 = vmul.f32 %v365_v17, %v365_v17  ;;  %474 = vst [vmem:[%s843_s28 + $0x70] sm:$0xff] %v849_v23  ;;  %v853_v24 = vpop.f32.mrb[1].mxu1  ;;  %v527_v15 = vmul.f32 %v849_v23, %v849_v23 }
  0xe8   : > { %463 = vst [vmem:[%s843_s28 + $0x18] sm:$0xff] %v718_v18  ;;  %v368_v19 = vpop.f32.mrb[3].mxu0  ;;  %472 = vst [vmem:[%s843_s28 + $0x60] sm:$0xff] %v853_v24  ;;  %v857_v28 = vpop.f32.mrb[2].mxu1  ;;  %v516_v30 = vmul.f32 %v718_v18, %v718_v18  ;;  %v525_v9 = vmul.f32 %v853_v24, %v853_v24 }
  0xe9   : > { %461 = vst [vmem:[%s843_s28 + $0x8] sm:$0xff] %v368_v19  ;;  %v484_v21 = vadd.f32 %v368_v19, %v365_v17  ;;  %v514_v22 = vmul.f32 %v368_v19, %v368_v19  ;;  %475 = vst [vmem:[%s843_s28 + $0x78] sm:$0xff] %v857_v28  ;;  %v861_v29 = vpop.f32.mrb[3].mxu1 }
  0xea   : > { %473 = vst [vmem:[%s843_s28 + $0x68] sm:$0xff] %v861_v29  ;;  %v526_v14 = vmul.f32 %v861_v29, %v861_v29 }
  0xeb   : > { %v485_v26 = vadd.f32 %v717_v16, %v484_v21  ;;  %v537_v27 = vadd.f32 %v514_v22, %v513_v20 }
  0xed   : > { %v538_v31 = vadd.f32 %v537_v27, %v515_v25  ;;  %v721_v32 = vpop.f32.mrb[4].mxu0  ;;  %v486_v33 = vadd.f32 %v718_v18, %v485_v26  ;;  %v528_v18 = vmul.f32 %v857_v28, %v857_v28 }
  0xee   : > { %466 = vst [vmem:[%s843_s28 + $0x30] sm:$0xff] %v721_v32  ;;  %v381_v34 = vpop.f32.mrb[5].mxu0  ;;  %v733_v43 = vpop.f32.mrb[4].mxu1  ;;  %v519_v45 = vmul.f32 %v721_v32, %v721_v32 }
  0xef   : > { %464 = vst [vmem:[%s843_s28 + $0x20] sm:$0xff] %v381_v34  ;;  %v487_v35 = vadd.f32 %v486_v33, %v381_v34  ;;  %v517_v36 = vmul.f32 %v381_v34, %v381_v34  ;;  %v539_v37 = vadd.f32 %v538_v31, %v516_v30  ;;  %v722_v38 = vpop.f32.mrb[6].mxu0  ;;  %478 = vst [vmem:[%s843_s28 + $0x90] sm:$0xff] %v733_v43  ;;  %v429_v44 = vpop.f32.mrb[5].mxu1 }
  0xf0   : > { %467 = vst [vmem:[%s843_s28 + $0x38] sm:$0xff] %v722_v38  ;;  %v384_v39 = vpop.f32.mrb[7].mxu0  ;;  %476 = vst [vmem:[%s843_s28 + $0x80] sm:$0xff] %v429_v44  ;;  %v734_v48 = vpop.f32.mrb[6].mxu1  ;;  %v520_v50 = vmul.f32 %v722_v38, %v722_v38  ;;  %v529_v21 = vmul.f32 %v429_v44, %v429_v44  ;;  %v531_v30 = vmul.f32 %v733_v43, %v733_v43 }
  0xf1   : > { %v540_v40 = vadd.f32 %v539_v37, %v517_v36  ;;  %465 = vst [vmem:[%s843_s28 + $0x28] sm:$0xff] %v384_v39  ;;  %v488_v41 = vadd.f32 %v487_v35, %v384_v39  ;;  %v518_v42 = vmul.f32 %v384_v39, %v384_v39  ;;  %479 = vst [vmem:[%s843_s28 + $0x98] sm:$0xff] %v734_v48  ;;  %v432_v49 = vpop.f32.mrb[7].mxu1 }
  0xf2   : > { %477 = vst [vmem:[%s843_s28 + $0x88] sm:$0xff] %v432_v49  ;;  %v530_v27 = vmul.f32 %v432_v49, %v432_v49 }
  0xf3   : > { %v489_v46 = vadd.f32 %v721_v32, %v488_v41  ;;  %v541_v47 = vadd.f32 %v540_v40, %v518_v42  ;;  %v532_v32 = vmul.f32 %v734_v48, %v734_v48 }
  0xf5   : > { %v542_v51 = vadd.f32 %v541_v47, %v519_v45  ;;  %v725_v52 = vpop.f32.mrb[8].mxu0  ;;  %v490_v53 = vadd.f32 %v722_v38, %v489_v46 }
  0xf6   : > { %470 = vst [vmem:[%s843_s28 + $0x50] sm:$0xff] %v725_v52  ;;  %v397_v54 = vpop.f32.mrb[9].mxu0  ;;  %v737_v63 = vpop.f32.mrb[8].mxu1  ;;  %v523_v1 = vmul.f32 %v725_v52, %v725_v52 }
  0xf7   : > { %468 = vst [vmem:[%s843_s28 + $0x40] sm:$0xff] %v397_v54  ;;  %v491_v55 = vadd.f32 %v490_v53, %v397_v54  ;;  %v521_v56 = vmul.f32 %v397_v54, %v397_v54  ;;  %v543_v57 = vadd.f32 %v542_v51, %v520_v50  ;;  %v726_v58 = vpop.f32.mrb[10].mxu0  ;;  %482 = vst [vmem:[%s843_s28 + $0xb0] sm:$0xff] %v737_v63  ;;  %v445_v0 = vpop.f32.mrb[9].mxu1 }
  0xf8   : > { %471 = vst [vmem:[%s843_s28 + $0x58] sm:$0xff] %v726_v58  ;;  %v400_v59 = vpop.f32.mrb[11].mxu0  ;;  %480 = vst [vmem:[%s843_s28 + $0xa0] sm:$0xff] %v445_v0  ;;  %v738_v4 = vpop.f32.mrb[10].mxu1  ;;  %v524_v6 = vmul.f32 %v726_v58, %v726_v58  ;;  %v533_v34 = vmul.f32 %v445_v0, %v445_v0  ;;  %v535_v39 = vmul.f32 %v737_v63, %v737_v63 }
  0xf9   : > { %v544_v60 = vadd.f32 %v543_v57, %v521_v56  ;;  %469 = vst [vmem:[%s843_s28 + $0x48] sm:$0xff] %v400_v59  ;;  %v492_v61 = vadd.f32 %v491_v55, %v400_v59  ;;  %v522_v62 = vmul.f32 %v400_v59, %v400_v59  ;;  %483 = vst [vmem:[%s843_s28 + $0xb8] sm:$0xff] %v738_v4  ;;  %v448_v5 = vpop.f32.mrb[11].mxu1 }
  0xfa   : > { %481 = vst [vmem:[%s843_s28 + $0xa8] sm:$0xff] %v448_v5  ;;  %v536_v42 = vmul.f32 %v738_v4, %v738_v4 }
  0xfb   : > { %v493_v2 = vadd.f32 %v725_v52, %v492_v61  ;;  %v545_v3 = vadd.f32 %v544_v60, %v522_v62 }
  0xfd   : > { %v546_v7 = vadd.f32 %v545_v3, %v523_v1  ;;  %v494_v8 = vadd.f32 %v726_v58, %v493_v2 }
  0xff   : > { %v495_v10 = vadd.f32 %v494_v8, %v853_v24  ;;  %v547_v11 = vadd.f32 %v546_v7, %v524_v6 }
 0x101   : > { %v548_v12 = vadd.f32 %v547_v11, %v525_v9  ;;  %v496_v13 = vadd.f32 %v495_v10, %v861_v29 }
 0x103   : > { %v497_v16 = vadd.f32 %v849_v23, %v496_v13  ;;  %v549_v17 = vadd.f32 %v548_v12, %v526_v14 }
 0x105   : > { %v550_v19 = vadd.f32 %v549_v17, %v527_v15  ;;  %v498_v20 = vadd.f32 %v857_v28, %v497_v16  ;;  %v534_v28 = vmul.f32 %v448_v5, %v448_v5 }
 0x107   : > { %v499_v22 = vadd.f32 %v498_v20, %v429_v44  ;;  %v551_v24 = vadd.f32 %v550_v19, %v528_v18 }
 0x109   : > { %v552_v25 = vadd.f32 %v551_v24, %v529_v21  ;;  %v500_v26 = vadd.f32 %v499_v22, %v432_v49 }
 0x10b   : > { %v501_v29 = vadd.f32 %v733_v43, %v500_v26  ;;  %v553_v31 = vadd.f32 %v552_v25, %v530_v27 }
 0x10d   : > { %v554_v33 = vadd.f32 %v553_v31, %v531_v30  ;;  %v502_v23 = vadd.f32 %v734_v48, %v501_v29 }
 0x10f   : > { %v503_v35 = vadd.f32 %v502_v23, %v445_v0  ;;  %v555_v36 = vadd.f32 %v554_v33, %v532_v32 }
 0x111   : > { %v556_v37 = vadd.f32 %v555_v36, %v533_v34  ;;  %v504_v38 = vadd.f32 %v503_v35, %v448_v5 }
 0x113   : > { %v505_v40 = vadd.f32 %v737_v63, %v504_v38  ;;  %v557_v41 = vadd.f32 %v556_v37, %v534_v28 }
 0x115   : > { %v506_v44 = vadd.f32 %v738_v4, %v505_v40  ;;  %v558_v45 = vadd.f32 %v557_v41, %v535_v39 }
 0x117   : > { %v507_v46 = vrot.slane %v506_v44, 4  ;;  %v559_v43 = vadd.f32 %v558_v45, %v536_v42 }
 0x119   : > { %v508_v47 = vadd.f32 %v507_v46, %v506_v44  ;;  %v560_v49 = vrot.slane %v559_v43, 4 }
 0x11b   : > { %v509_v50 = vrot.slane %v508_v47, 2  ;;  %v561_v48 = vadd.f32 %v560_v49, %v559_v43 }
 0x11d   : > { %v510_v51 = vadd.f32 %v509_v50, %v508_v47  ;;  %v562_v52 = vrot.slane %v561_v48, 2 }
 0x11f   : > { %v511_v53 = vrot.slane %v510_v51, 1  ;;  %v563_v54 = vadd.f32 %v562_v52, %v561_v48 }
 0x121   : > { %v564_v55 = vrot.slane %v563_v54, 1  ;;  %v512_v56 = vadd.f32 %v511_v53, %v510_v51 }
 0x123   : > { %v565_v57 = vadd.f32 %v564_v55, %v563_v54 }
 0x125   : > { %v567_v58 = vsel %vm566_vm2, %v512_v56, %v565_v57 }
 0x126   : > { %v568_v59 = vsel %vm327_vm0, %v567_v58, 0.0 }
 0x127   : > { %569 = vst [vmem:[%s184_s5] sm:$0xff] %v568_v59 }
 0x128 PF: > { %s14_s12 = sadd.s32 1, %s776_s12  }
 0x129   : > { %p11_p5 = scmp.ge.s32.totalorder %s14_s12, 5  }
 0x12b   :  { %13 = sbr.rel (!%p11_p5) target bundleno = 1 (0x1), region = 70 }

// kernel: conv_bn_silu.3
= control target key start
LH: loop header
LB: loop body
LE: loop exit
PB: predicated region body
PF: predicated region fallthrough
CT: control target
= control target key end

     0   :  { %s459_s12 = smov 0   ;;  %s589_s0 = inlined_call_operand.vmem [shape: f32[576,128], index: 0, kind: input, shape index: {}]   ;;  %s590_s1 = inlined_call_operand.vmem [shape: f32[1,128], index: 1, kind: input, shape index: {}]   ;;  %s591_s2 = inlined_call_operand.vmem [shape: f32[1,128], index: 2, kind: input, shape index: {}]   ;;  %s592_s3 = inlined_call_operand.vmem [shape: f32[576,128], index: 3, kind: output, shape index: {}]  }
   0x1 LB: > { %s412_s13 = sadd.s32 4294967295, %s437_s12   ;;  %p416_p0 = scmp.ge.s32.totalorder %s437_s12, 1  ;;  %s437_s12 = sphi %s459_s12, %s13_s12  }
   0x2   : > { %p138_p1 = scmp.lt.s32.totalorder %s437_s12, 4 }
   0x4   : > { %p139_p2 = pnand %p416_p0, %p138_p1 }
   0x5   : > { %s162_s14 = smul.u32 (!%p139_p2), 24, %s412_s13  ;;  %v473_v0 = vld [vmem:[%s590_s1] ss:$0 sm:$0xff] (!%p139_p2) }
   0x6   : > { %142 = sbr.rel (%p139_p2) target bundleno = 52 (0x34), region = 32  ;;  %v483_v1 = vld [vmem:[%s591_s2] ss:$0 sm:$0xff] (!%p139_p2) }
   0x7   : > { %p163_p3 = scmp.lt.s32.totalorder (!%p139_p2), %s162_s14, 71 }
   0xd   : > { %s594_s14 = smov (!%p163_p3, %s162_s14), 71 }
   0xe   : > { %s417_s15 = sshll.u32 %s594_s14, 3 }
   0xf   : > { %s478_s20 = scalar_lea.vmem %s589_s0, %s417_s15  ;;  %s511_s25 = scalar_lea.vmem %s592_s3, %s417_s15 }
  0x10   : > { %v174_v2 = vld [vmem:[%s478_s20] sm:$0xff]  ;;  %v175_v3 = vld [vmem:[%s478_s20 + $0x8] sm:$0xff]  ;;  %v176_v4 = vld [vmem:[%s478_s20 + $0x10] sm:$0xff] }
  0x11   : > { %v205_v5 = vmul.f32 %v473_v0, %v174_v2  ;;  %v206_v6 = vmul.f32 %v473_v0, %v175_v3  ;;  %v207_v7 = vmul.f32 %v473_v0, %v176_v4  ;;  %v177_v8 = vld [vmem:[%s478_s20 + $0x18] sm:$0xff]  ;;  %v178_v9 = vld [vmem:[%s478_s20 + $0x20] sm:$0xff]  ;;  %v179_v10 = vld [vmem:[%s478_s20 + $0x28] sm:$0xff] }
  0x12   : > { %v208_v11 = vmul.f32 %v473_v0, %v177_v8  ;;  %v209_v12 = vmul.f32 %v473_v0, %v178_v9  ;;  %v210_v13 = vmul.f32 %v473_v0, %v179_v10  ;;  %v180_v14 = vld [vmem:[%s478_s20 + $0x30] sm:$0xff]  ;;  %v181_v15 = vld [vmem:[%s478_s20 + $0x38] sm:$0xff]  ;;  %v182_v24 = vld [vmem:[%s478_s20 + $0x40] sm:$0xff] }
  0x13   : > { %v236_v16 = vadd.f32 %v483_v1, %v205_v5  ;;  %v237_v17 = vadd.f32 %v483_v1, %v206_v6  ;;  %v238_v18 = vadd.f32 %v483_v1, %v207_v7  ;;  %v211_v19 = vmul.f32 %v473_v0, %v180_v14  ;;  %v183_v32 = vld [vmem:[%s478_s20 + $0x48] sm:$0xff]  ;;  %v184_v33 = vld [vmem:[%s478_s20 + $0x50] sm:$0xff]  ;;  %v185_v34 = vld [vmem:[%s478_s20 + $0x58] sm:$0xff] }
  0x14   : > { %v239_v20 = vadd.f32 %v483_v1, %v208_v11  ;;  %v240_v21 = vadd.f32 %v483_v1, %v209_v12  ;;  %v241_v22 = vadd.f32 %v483_v1, %v210_v13  ;;  %v212_v23 = vmul.f32 %v473_v0, %v181_v15  ;;  %v186_v46 = vld [vmem:[%s478_s20 + $0x60] sm:$0xff]  ;;  %v187_v47 = vld [vmem:[%s478_s20 + $0x68] sm:$0xff]  ;;  %v188_v58 = vld [vmem:[%s478_s20 + $0x70] sm:$0xff] }
  0x15   : > { %vm260_vm0 = vcmp.ge.f32.partialorder %v236_v16, 0.0  ;;  %v284_v25 = vmul.f32 0.1, %v236_v16  ;;  %vm261_vm1 = vcmp.ge.f32.partialorder %v237_v17, 0.0  ;;  %v285_v26 = vmul.f32 0.1, %v237_v17 }
  0x16   : > { %vm262_vm2 = vcmp.ge.f32.partialorder %v238_v18, 0.0  ;;  %v286_v27 = vmul.f32 0.1, %v238_v18  ;;  %vm263_vm3 = vcmp.ge.f32.partialorder %v239_v20, 0.0  ;;  %v287_v28 = vmul.f32 0.1, %v239_v20 }
  0x17   : > { %v308_v29 = vsel %vm260_vm0, %v236_v16, %v284_v25  ;;  %v309_v30 = vsel %vm261_vm1, %v237_v17, %v285_v26  ;;  %vm264_vm4 = vcmp.ge.f32.partialorder %v240_v21, 0.0  ;;  %v288_v31 = vmul.f32 0.1, %v240_v21  ;;  %v189_v59 = vld [vmem:[%s478_s20 + $0x78] sm:$0xff]  ;;  %v190_v6 = vld [vmem:[%s478_s20 + $0x80] sm:$0xff]  ;;  %v191_v7 = vld [vmem:[%s478_s20 + $0x88] sm:$0xff] }
  0x18   : > { %332 = vst [vmem:[%s511_s25] sm:$0xff] %v308_v29  ;;  %333 = vst [vmem:[%s511_s25 + $0x8] sm:$0xff] %v309_v30  ;;  %v310_v35 = vsel %vm262_vm2, %v238_v18, %v286_v27  ;;  %v311_v36 = vsel %vm263_vm3, %v239_v20, %v287_v28  ;;  %vm265_vm5 = vcmp.ge.f32.partialorder %v241_v22, 0.0  ;;  %v289_v37 = vmul.f32 0.1, %v241_v22  ;;  %v192_v12 = vld [vmem:[%s478_s20 + $0x90] sm:$0xff]  ;;  %v193_v13 = vld [vmem:[%s478_s20 + $0x98] sm:$0xff] }
  0x19   : > { %334 = vst [vmem:[%s511_s25 + $0x10] sm:$0xff] %v310_v35  ;;  %335 = vst [vmem:[%s511_s25 + $0x18] sm:$0xff] %v311_v36  ;;  %v312_v38 = vsel %vm264_vm4, %v240_v21, %v288_v31  ;;  %v242_v39 = vadd.f32 %v483_v1, %v211_v19  ;;  %v243_v40 = vadd.f32 %v483_v1, %v212_v23  ;;  %v195_v25 = vld [vmem:[%s478_s20 + $0xa8] sm:$0xff]  ;;  %v196_v36 = vld [vmem:[%s478_s20 + $0xb0] sm:$0xff] }
  0x1a   : > { %v213_v41 = vmul.f32 %v473_v0, %v182_v24  ;;  %336 = vst [vmem:[%s511_s25 + $0x20] sm:$0xff] %v312_v38  ;;  %v313_v42 = vsel %vm265_vm5, %v241_v22, %v289_v37  ;;  %v214_v43 = vmul.f32 %v473_v0, %v183_v32  ;;  %v215_v44 = vmul.f32 %v473_v0, %v184_v33  ;;  %v194_v24 = vld [vmem:[%s478_s20 + $0xa0] sm:$0xff]  ;;  %v197_v37 = vld [vmem:[%s478_s20 + $0xb8] sm:$0xff] }
  0x1b   : > { %v216_v45 = vmul.f32 %v473_v0, %v185_v34  ;;  %337 = vst [vmem:[%s511_s25 + $0x28] sm:$0xff] %v313_v42  ;;  %vm266_vm6 = vcmp.ge.f32.partialorder %v242_v39, 0.0  ;;  %v290_v48 = vmul.f32 0.1, %v242_v39  ;;  %vm267_vm7 = vcmp.ge.f32.partialorder %v243_v40, 0.0 }
  0x1c   : > { %v291_v49 = vmul.f32 0.1, %v243_v40  ;;  %v244_v50 = vadd.f32 %v483_v1, %v213_v41  ;;  %v245_v51 = vadd.f32 %v483_v1, %v214_v43  ;;  %v246_v52 = vadd.f32 %v483_v1, %v215_v44 }
  0x1d   : > { %v247_v53 = vadd.f32 %v483_v1, %v216_v45  ;;  %v314_v54 = vsel %vm266_vm6, %v242_v39, %v290_v48  ;;  %v217_v56 = vmul.f32 %v473_v0, %v186_v46  ;;  %v218_v57 = vmul.f32 %v473_v0, %v187_v47 }
  0x1e   : > { %v315_v55 = vsel %vm267_vm7, %v243_v40, %v291_v49  ;;  %338 = vst [vmem:[%s511_s25 + $0x30] sm:$0xff] %v314_v54  ;;  %vm268_vm8 = vcmp.ge.f32.partialorder %v244_v50, 0.0  ;;  %v292_v60 = vmul.f32 0.1, %v244_v50  ;;  %vm269_vm9 = vcmp.ge.f32.partialorder %v245_v51, 0.0 }
  0x1f   : > { %339 = vst [vmem:[%s511_s25 + $0x38] sm:$0xff] %v315_v55  ;;  %v293_v61 = vmul.f32 0.1, %v245_v51  ;;  %vm270_vm10 = vcmp.ge.f32.partialorder %v246_v52, 0.0  ;;  %v294_v62 = vmul.f32 0.1, %v246_v52  ;;  %v248_v4 = vadd.f32 %v483_v1, %v217_v56 }
  0x20   : > { %vm271_vm11 = vcmp.ge.f32.partialorder %v247_v53, 0.0  ;;  %v295_v63 = vmul.f32 0.1, %v247_v53  ;;  %v316_v2 = vsel %vm268_vm8, %v244_v50, %v292_v60  ;;  %v249_v5 = vadd.f32 %v483_v1, %v218_v57 }
  0x21   : > { %v317_v3 = vsel %vm269_vm9, %v245_v51, %v293_v61  ;;  %340 = vst [vmem:[%s511_s25 + $0x40] sm:$0xff] %v316_v2  ;;  %v318_v8 = vsel %vm270_vm10, %v246_v52, %v294_v62  ;;  %v219_v10 = vmul.f32 %v473_v0, %v188_v58  ;;  %v220_v11 = vmul.f32 %v473_v0, %v189_v59 }
  0x22   : > { %341 = vst [vmem:[%s511_s25 + $0x48] sm:$0xff] %v317_v3  ;;  %v319_v9 = vsel %vm271_vm11, %v247_v53, %v295_v63  ;;  %342 = vst [vmem:[%s511_s25 + $0x50] sm:$0xff] %v318_v8  ;;  %vm272_vm12 = vcmp.ge.f32.partialorder %v248_v4, 0.0  ;;  %v296_v14 = vmul.f32 0.1, %v248_v4  ;;  %vm273_vm13 = vcmp.ge.f32.partialorder %v249_v5, 0.0 }
  0x23   : > { %343 = vst [vmem:[%s511_s25 + $0x58] sm:$0xff] %v319_v9  ;;  %v297_v15 = vmul.f32 0.1, %v249_v5  ;;  %v250_v16 = vadd.f32 %v483_v1, %v219_v10  ;;  %v251_v17 = vadd.f32 %v483_v1, %v220_v11  ;;  %v221_v18 = vmul.f32 %v473_v0, %v190_v6 }
  0x24   : > { %v222_v19 = vmul.f32 %v473_v0, %v191_v7  ;;  %v320_v20 = vsel %vm272_vm12, %v248_v4, %v296_v14  ;;  %v223_v22 = vmul.f32 %v473_v0, %v192_v12  ;;  %v224_v23 = vmul.f32 %v473_v0, %v193_v13 }
  0x25   : > { %v321_v21 = vsel %vm273_vm13, %v249_v5, %v297_v15  ;;  %344 = vst [vmem:[%s511_s25 + $0x60] sm:$0xff] %v320_v20  ;;  %vm274_vm14 = vcmp.ge.f32.partialorder %v250_v16, 0.0  ;;  %v298_v26 = vmul.f32 0.1, %v250_v16  ;;  %vm275_vm15 = vcmp.ge.f32.partialorder %v251_v17, 0.0 }
  0x26   : > { %345 = vst [vmem:[%s511_s25 + $0x68] sm:$0xff] %v321_v21  ;;  %v299_v27 = vmul.f32 0.1, %v251_v17  ;;  %v252_v28 = vadd.f32 %v483_v1, %v221_v18  ;;  %v253_v29 = vadd.f32 %v483_v1, %v222_v19  ;;  %v254_v30 = vadd.f32 %v483_v1, %v223_v22 }
  0x27   : > { %v255_v31 = vadd.f32 %v483_v1, %v224_v23  ;;  %v322_v32 = vsel %vm274_vm14, %v250_v16, %v298_v26  ;;  %v225_v34 = vmul.f32 %v473_v0, %v194_v24  ;;  %v226_v35 = vmul.f32 %v473_v0, %v195_v25 }
  0x28   : > { %v323_v33 = vsel %vm275_vm15, %v251_v17, %v299_v27  ;;  %346 = vst [vmem:[%s511_s25 + $0x70] sm:$0xff] %v322_v32  ;;  %vm276_vm0 = vcmp.ge.f32.partialorder %v252_v28, 0.0  ;;  %v300_v38 = vmul.f32 0.1, %v252_v28  ;;  %vm277_vm1 = vcmp.ge.f32.partialorder %v253_v29, 0.0 }
  0x29   : > { %347 = vst [vmem:[%s511_s25 + $0x78] sm:$0xff] %v323_v33  ;;  %v301_v39 = vmul.f32 0.1, %v253_v29  ;;  %vm278_vm2 = vcmp.ge.f32.partialorder %v254_v30, 0.0  ;;  %v302_v40 = vmul.f32 0.1, %v254_v30  ;;  %v256_v44 = vadd.f32 %v483_v1, %v225_v34 }
  0x2a   : > { %vm279_vm3 = vcmp.ge.f32.partialorder %v255_v31, 0.0  ;;  %v303_v41 = vmul.f32 0.1, %v255_v31  ;;  %v324_v42 = vsel %vm276_vm0, %v252_v28, %v300_v38  ;;  %v257_v45 = vadd.f32 %v483_v1, %v226_v35 }
  0x2b   : > { %v325_v43 = vsel %vm277_vm1, %v253_v29, %v301_v39  ;;  %348 = vst [vmem:[%s511_s25 + $0x80] sm:$0xff] %v324_v42  ;;  %v326_v46 = vsel %vm278_vm2, %v254_v30, %v302_v40  ;;  %v227_v48 = vmul.f32 %v473_v0, %v196_v36  ;;  %v228_v49 = vmul.f32 %v473_v0, %v197_v37 }
  0x2c   : > { %349 = vst [vmem:[%s511_s25 + $0x88] sm:$0xff] %v325_v43  ;;  %v327_v47 = vsel %vm279_vm3, %v255_v31, %v303_v41  ;;  %350 = vst [vmem:[%s511_s25 + $0x90] sm:$0xff] %v326_v46  ;;  %vm280_vm4 = vcmp.ge.f32.partialorder %v256_v44, 0.0  ;;  %v304_v50 = vmul.f32 0.1, %v256_v44  ;;  %vm281_vm5 = vcmp.ge.f32.partialorder %v257_v45, 0.0 }
  0x2d   : > { %351 = vst [vmem:[%s511_s25 + $0x98] sm:$0xff] %v327_v47  ;;  %v305_v51 = vmul.f32 0.1, %v257_v45  ;;  %v258_v52 = vadd.f32 %v483_v1, %v227_v48  ;;  %v259_v53 = vadd.f32 %v483_v1, %v228_v49 }
  0x2e   : > { %v328_v54 = vsel %vm280_vm4, %v256_v44, %v304_v50 }
  0x2f   : > { %v329_v55 = vsel %vm281_vm5, %v257_v45, %v305_v51  ;;  %352 = vst [vmem:[%s511_s25 + $0xa0] sm:$0xff] %v328_v54  ;;  %vm282_vm6 = vcmp.ge.f32.partialorder %v258_v52, 0.0  ;;  %v306_v56 = vmul.f32 0.1, %v258_v52  ;;  %vm283_vm7 = vcmp.ge.f32.partialorder %v259_v53, 0.0 }
  0x30   : > { %353 = vst [vmem:[%s511_s25 + $0xa8] sm:$0xff] %v329_v55  ;;  %v307_v0 = vmul.f32 0.1, %v259_v53 }
  0x31   : > { %v330_v57 = vsel %vm282_vm6, %v258_v52, %v306_v56 }
  0x32   : > { %v331_v58 = vsel %vm283_vm7, %v259_v53, %v307_v0  ;;  %354 = vst [vmem:[%s511_s25 + $0xb0] sm:$0xff] %v330_v57 }
  0x33   : > { %355 = vst [vmem:[%s511_s25 + $0xb8] sm:$0xff] %v331_v58 }
  0x34 PF: > { %s13_s12 = sadd.s32 1, %s437_s12  }
  0x35   : > { %p10_p4 = scmp.ge.s32.totalorder %s13_s12, 5  }
  0x37   :  { %12 = sbr.rel (!%p10_p4) target bundleno = 1 (0x1), region = 62 }

</bundles_post_ra>
